<compile_context>
chip_gen: v6e
topology: v6e:2x2x1
jax: 0.10.0
libtpu: 0.0.40
codegen_flags: <defaults>
</compile_context>

<pallas_src>
import math
from functools import partial

import numpy as np
import jax
import jax.numpy as jnp
from jax.experimental import pallas as pl
from jax.experimental.pallas import tpu as pltpu

HIDDEN = 128     # fixed by the module
HEAD_PAD = 128   # lane-dense padded width of the fused actor|critic head output
MAX_TB = 256     # max batch rows per grid step


# ----------------------------------------------------------------------------
# Fused Pallas kernel: feature MLP + actor/critic heads, all in VMEM
# ----------------------------------------------------------------------------
def _fused_mlp_kernel(x_ref, w1_ref, b1_ref, w2_ref, b2_ref, w3_ref, b3_ref, o_ref):
    # state arrives as f32; cast to bf16 in-VMEM (no separate XLA convert pass over HBM)
    x = x_ref[...].astype(jnp.bfloat16)
    # feature layer 1: (TB,D) @ (D,128) + b1, ReLU   (bf16 MXU inputs, f32 accumulate)
    h = jnp.dot(x, w1_ref[...], preferred_element_type=jnp.float32)
    h = jnp.maximum(h + b1_ref[...], 0.0)            # f32 bias+ReLU on accumulator (v5e-safe)
    # feature layer 2: (TB,128) @ (128,128) + b2, ReLU
    h = jnp.dot(h.astype(jnp.bfloat16), w2_ref[...], preferred_element_type=jnp.float32)
    h = jnp.maximum(h + b2_ref[...], 0.0)
    # fused actor|critic head: (TB,128) @ (128,128-padded) + b3  (lane-dense store)
    y = jnp.dot(h.astype(jnp.bfloat16), w3_ref[...], preferred_element_type=jnp.float32)
    o_ref[...] = (y + b3_ref[...]).astype(o_ref.dtype)


def _round_up(n, m):
    return ((n + m - 1) // m) * m


@partial(jax.jit, static_argnames=("output_size",))
def fused_forward(packed, state, output_size):
    """state: (B, D) f32. Returns (policy (B,output_size), value (B,1)), f32."""
    B, D = state.shape
    w1, b1, w2, b2, w3, b3 = (packed[k] for k in ("w1", "b1", "w2", "b2", "w3", "b3"))

    # Batch tiling: pad rows to a multiple of 16 (bf16 sublane packing), tile over grid.
    tb = min(MAX_TB, _round_up(B, 16))
    b_pad = _round_up(B, tb)
    x = state if b_pad == B else jnp.pad(state, ((0, b_pad - B), (0, 0)))
    grid = (b_pad // tb,)

    flops = 2 * b_pad * (D * HIDDEN + HIDDEN * HIDDEN + HIDDEN * HEAD_PAD)
    bytes_accessed = (
        sum(int(np.prod(a.shape)) * a.dtype.itemsize for a in (w1, b1, w2, b2, w3, b3))
        + b_pad * D * 4           # f32 state in (cast happens in-kernel)
        + b_pad * HEAD_PAD * 4    # f32 out
    )

    out = pl.pallas_call(
        _fused_mlp_kernel,
        out_shape=jax.ShapeDtypeStruct((b_pad, HEAD_PAD), jnp.float32),
        grid=grid,
        in_specs=[
            pl.BlockSpec((tb, D), lambda i: (i, 0)),            # x: streamed per tile
            pl.BlockSpec((D, HIDDEN), lambda i: (0, 0)),         # weights/biases: resident
            pl.BlockSpec((1, HIDDEN), lambda i: (0, 0)),
            pl.BlockSpec((HIDDEN, HIDDEN), lambda i: (0, 0)),
            pl.BlockSpec((1, HIDDEN), lambda i: (0, 0)),
            pl.BlockSpec((HIDDEN, HEAD_PAD), lambda i: (0, 0)),
            pl.BlockSpec((1, HEAD_PAD), lambda i: (0, 0)),
        ],
        out_specs=pl.BlockSpec((tb, HEAD_PAD), lambda i: (i, 0)),
        compiler_params=pltpu.CompilerParams(
            dimension_semantics=("parallel",),        # v7x: shard batch tiles across 2 TCs
            vmem_limit_bytes=32 * 1024 * 1024,        # explicit budget, safe on v7x 64 MiB
        ),
        cost_estimate=pl.CostEstimate(
            flops=flops, transcendentals=0, bytes_accessed=bytes_accessed
        ),
    )(x, w1, b1, w2, b2, w3, b3)

    policy = out[:B, :output_size]
    value = out[:B, output_size:output_size + 1]
    return policy, value


# ----------------------------------------------------------------------------
# Parameter init (mirrors the module __init__: kaiming_uniform_(a=1.0), zero bias)
# ----------------------------------------------------------------------------
def _kaiming_uniform(key, shape, fan_in, a=1.0):
    gain = math.sqrt(2.0 / (1.0 + a * a))
    bound = gain * math.sqrt(3.0 / fan_in)
    return jax.random.uniform(key, shape, jnp.float32, -bound, bound)


def init_params(key, input_size, output_size):
    """PyTorch-layout (out, in) f32 params, used by the pure-JAX reference."""
    k1, k2, k3, k4 = jax.random.split(key, 4)
    p = {}
    p["f1w"] = _kaiming_uniform(k1, (HIDDEN, input_size), input_size)
    p["f1b"] = jnp.zeros((HIDDEN,), jnp.float32)
    p["f2w"] = _kaiming_uniform(k2, (HIDDEN, HIDDEN), HIDDEN)
    p["f2b"] = jnp.zeros((HIDDEN,), jnp.float32)
    p["aw"] = _kaiming_uniform(k3, (output_size, HIDDEN), HIDDEN)
    p["ab"] = jnp.zeros((output_size,), jnp.float32)
    p["cw"] = _kaiming_uniform(k4, (1, HIDDEN), HIDDEN)
    p["cb"] = jnp.zeros((1,), jnp.float32)
    return p


def pack_params(p, output_size):
    """One-time packing: transpose to (K,N), fuse+pad actor/critic head, cast to bf16."""
    nh = output_size + 1
    assert nh <= HEAD_PAD, (
        f"output_size + 1 = {nh} exceeds fused head width HEAD_PAD={HEAD_PAD}")
    w3 = jnp.concatenate([p["aw"].T, p["cw"].T], axis=1)            # (128, nh)
    w3 = jnp.pad(w3, ((0, 0), (0, HEAD_PAD - nh)))                  # (128, 128) lane-dense
    b3 = jnp.pad(jnp.concatenate([p["ab"], p["cb"]]), (0, HEAD_PAD - nh))
    return {
        "w1": p["f1w"].T.astype(jnp.bfloat16),                      # (D, 128)
        "b1": p["f1b"].reshape(1, HIDDEN),                          # f32, added post-acc
        "w2": p["f2w"].T.astype(jnp.bfloat16),                      # (128, 128)
        "b2": p["f2b"].reshape(1, HIDDEN),
        "w3": w3.astype(jnp.bfloat16),                              # (128, 128)
        "b3": b3.reshape(1, HEAD_PAD),
    }


# ----------------------------------------------------------------------------
# Pure-JAX f32 reference (for correctness check)
# ----------------------------------------------------------------------------
def reference_forward(p, state):
    x = jnp.maximum(state @ p["f1w"].T + p["f1b"], 0.0)
    x = jnp.maximum(x @ p["f2w"].T + p["f2b"], 0.0)
    policy = x @ p["aw"].T + p["ab"]
    value = x @ p["cw"].T + p["cb"]
    return policy, value


if __name__ == "__main__":
    input_size = 64
    output_size = 12  # COMPLEX_MOVEMENT action count

    key = jax.random.PRNGKey(0)
    k_param, k_small, k_big = jax.random.split(key, 3)

    params = init_params(k_param, input_size, output_size)
    packed = pack_params(params, output_size)

    # --- small case required by the spec (B=2): padded to one 16-row tile internally ---
    state_small = jax.random.normal(k_small, (2, input_size), jnp.float32)
    policy, value = fused_forward(packed, state_small, output_size)
    policy = jax.block_until_ready(policy)
    value = jax.block_until_ready(value)
    assert policy.shape == (2, output_size) and value.shape == (2, 1)
    ref_policy, ref_value = reference_forward(params, state_small)
    # bf16 MXU inputs with f32 accumulation -> a few e-3 typical error; 3e-2 is safe.
    np.testing.assert_allclose(np.asarray(policy), np.asarray(ref_policy), rtol=3e-2, atol=3e-2)
    np.testing.assert_allclose(np.asarray(value), np.asarray(ref_value), rtol=3e-2, atol=3e-2)

    # --- rollout-sized case exercising the multi-tile batch grid (300 -> 2 x 256 tiles) ---
    state_big = jax.random.normal(k_big, (300, input_size), jnp.float32)
    policy_b, value_b = fused_forward(packed, state_big, output_size)
    policy_b = jax.block_until_ready(policy_b)
    value_b = jax.block_until_ready(value_b)
    assert policy_b.shape == (300, output_size) and value_b.shape == (300, 1)
    ref_policy_b, ref_value_b = reference_forward(params, state_big)
    np.testing.assert_allclose(np.asarray(policy_b), np.asarray(ref_policy_b), rtol=3e-2, atol=3e-2)
    np.testing.assert_allclose(np.asarray(value_b), np.asarray(ref_value_b), rtol=3e-2, atol=3e-2)

    print("KERNEL_OK")
</pallas_src>

<mosaic_0001>
module attributes {stable_mosaic.version = 11 : i64} {
  func.func @_fused_mlp_kernel(%arg0: i32, %arg1: memref<16x64xf32, #tpu.memory_space<vmem>>, %arg2: memref<64x128xbf16, #tpu.memory_space<vmem>>, %arg3: memref<1x128xf32, #tpu.memory_space<vmem>>, %arg4: memref<128x128xbf16, #tpu.memory_space<vmem>>, %arg5: memref<1x128xf32, #tpu.memory_space<vmem>>, %arg6: memref<128x128xbf16, #tpu.memory_space<vmem>>, %arg7: memref<1x128xf32, #tpu.memory_space<vmem>>, %arg8: memref<16x128xf32, #tpu.memory_space<vmem>>) attributes {dimension_semantics = [#tpu.dimension_semantics<parallel>], iteration_bounds = array<i64: 1>, scalar_prefetch = 0 : i64, scratch_operands = 0 : i64, tpu.core_type = #tpu.core_type<tc>, window_params = [{transform_indices = @transform_0, window_bounds = array<i64: 16, 64>}, {pipeline_mode = #tpu.pipeline_mode<synchronous>, transform_indices = @transform_1, window_bounds = array<i64: 64, 128>}, {pipeline_mode = #tpu.pipeline_mode<synchronous>, transform_indices = @transform_2, window_bounds = array<i64: 1, 128>}, {pipeline_mode = #tpu.pipeline_mode<synchronous>, transform_indices = @transform_3, window_bounds = array<i64: 128, 128>}, {pipeline_mode = #tpu.pipeline_mode<synchronous>, transform_indices = @transform_4, window_bounds = array<i64: 1, 128>}, {pipeline_mode = #tpu.pipeline_mode<synchronous>, transform_indices = @transform_5, window_bounds = array<i64: 128, 128>}, {pipeline_mode = #tpu.pipeline_mode<synchronous>, transform_indices = @transform_6, window_bounds = array<i64: 1, 128>}, {transform_indices = @transform_7, window_bounds = array<i64: 16, 128>}]} {
    %c0 = arith.constant 0 : index
    %c0_0 = arith.constant 0 : index
    %0 = vector.load %arg1[%c0, %c0_0] : memref<16x64xf32, #tpu.memory_space<vmem>>, vector<16x64xf32>
    %1 = arith.truncf %0 : vector<16x64xf32> to vector<16x64xbf16>
    %c0_1 = arith.constant 0 : index
    %c0_2 = arith.constant 0 : index
    %2 = vector.load %arg2[%c0_1, %c0_2] : memref<64x128xbf16, #tpu.memory_space<vmem>>, vector<64x128xbf16>
    %cst = arith.constant dense<0.000000e+00> : vector<16x128xf32>
    %3 = tpu.matmul %1, %2, %cst {dimension_numbers = #tpu.dot_dimension_numbers<[1], [0], [0], [1], [0, 0, 1, 1], [], []>} : vector<16x64xbf16>, vector<64x128xbf16>, vector<16x128xf32> -> vector<16x128xf32>
    %c0_3 = arith.constant 0 : index
    %c0_4 = arith.constant 0 : index
    %4 = vector.load %arg3[%c0_3, %c0_4] : memref<1x128xf32, #tpu.memory_space<vmem>>, vector<1x128xf32>
    %5 = vector.broadcast %4 : vector<1x128xf32> to vector<16x128xf32>
    %6 = arith.addf %3, %5 : vector<16x128xf32>
    %cst_5 = arith.constant 0.000000e+00 : f32
    %7 = vector.broadcast %cst_5 : f32 to vector<16x128xf32>
    %8 = arith.maximumf %6, %7 : vector<16x128xf32>
    %9 = arith.truncf %8 : vector<16x128xf32> to vector<16x128xbf16>
    %c0_6 = arith.constant 0 : index
    %c0_7 = arith.constant 0 : index
    %10 = vector.load %arg4[%c0_6, %c0_7] : memref<128x128xbf16, #tpu.memory_space<vmem>>, vector<128x128xbf16>
    %cst_8 = arith.constant dense<0.000000e+00> : vector<16x128xf32>
    %11 = tpu.matmul %9, %10, %cst_8 {dimension_numbers = #tpu.dot_dimension_numbers<[1], [0], [0], [1], [0, 0, 1, 1], [], []>} : vector<16x128xbf16>, vector<128x128xbf16>, vector<16x128xf32> -> vector<16x128xf32>
    %c0_9 = arith.constant 0 : index
    %c0_10 = arith.constant 0 : index
    %12 = vector.load %arg5[%c0_9, %c0_10] : memref<1x128xf32, #tpu.memory_space<vmem>>, vector<1x128xf32>
    %13 = vector.broadcast %12 : vector<1x128xf32> to vector<16x128xf32>
    %14 = arith.addf %11, %13 : vector<16x128xf32>
    %cst_11 = arith.constant 0.000000e+00 : f32
    %15 = vector.broadcast %cst_11 : f32 to vector<16x128xf32>
    %16 = arith.maximumf %14, %15 : vector<16x128xf32>
    %17 = arith.truncf %16 : vector<16x128xf32> to vector<16x128xbf16>
    %c0_12 = arith.constant 0 : index
    %c0_13 = arith.constant 0 : index
    %18 = vector.load %arg6[%c0_12, %c0_13] : memref<128x128xbf16, #tpu.memory_space<vmem>>, vector<128x128xbf16>
    %cst_14 = arith.constant dense<0.000000e+00> : vector<16x128xf32>
    %19 = tpu.matmul %17, %18, %cst_14 {dimension_numbers = #tpu.dot_dimension_numbers<[1], [0], [0], [1], [0, 0, 1, 1], [], []>} : vector<16x128xbf16>, vector<128x128xbf16>, vector<16x128xf32> -> vector<16x128xf32>
    %c0_15 = arith.constant 0 : index
    %c0_16 = arith.constant 0 : index
    %20 = vector.load %arg7[%c0_15, %c0_16] : memref<1x128xf32, #tpu.memory_space<vmem>>, vector<1x128xf32>
    %21 = vector.broadcast %20 : vector<1x128xf32> to vector<16x128xf32>
    %22 = arith.addf %19, %21 : vector<16x128xf32>
    %c0_17 = arith.constant 0 : index
    %c0_18 = arith.constant 0 : index
    %23 = vector.load %arg8[%c0_17, %c0_18] : memref<16x128xf32, #tpu.memory_space<vmem>>, vector<16x128xf32>
    tpu.vector_store %arg8[%c0_17, %c0_18], %22 {strides = array<i32>} : memref<16x128xf32, #tpu.memory_space<vmem>>, vector<16x128xf32>,
    return
  }
  func.func @transform_0(%arg0: i32) -> (i32, i32) {
    %c0_i32 = arith.constant 0 : i32
    %c0_i32_0 = arith.constant 0 : i32
    return %arg0, %c0_i32 : i32, i32
  }
  func.func @transform_1(%arg0: i32) -> (i32, i32) {
    %c0_i32 = arith.constant 0 : i32
    %c0_i32_0 = arith.constant 0 : i32
    %c0_i32_1 = arith.constant 0 : i32
    return %c0_i32, %c0_i32_0 : i32, i32
  }
  func.func @transform_2(%arg0: i32) -> (i32, i32) {
    %c0_i32 = arith.constant 0 : i32
    %c0_i32_0 = arith.constant 0 : i32
    %c0_i32_1 = arith.constant 0 : i32
    return %c0_i32, %c0_i32_0 : i32, i32
  }
  func.func @transform_3(%arg0: i32) -> (i32, i32) {
    %c0_i32 = arith.constant 0 : i32
    %c0_i32_0 = arith.constant 0 : i32
    %c0_i32_1 = arith.constant 0 : i32
    return %c0_i32, %c0_i32_0 : i32, i32
  }
  func.func @transform_4(%arg0: i32) -> (i32, i32) {
    %c0_i32 = arith.constant 0 : i32
    %c0_i32_0 = arith.constant 0 : i32
    %c0_i32_1 = arith.constant 0 : i32
    return %c0_i32, %c0_i32_0 : i32, i32
  }
  func.func @transform_5(%arg0: i32) -> (i32, i32) {
    %c0_i32 = arith.constant 0 : i32
    %c0_i32_0 = arith.constant 0 : i32
    %c0_i32_1 = arith.constant 0 : i32
    return %c0_i32, %c0_i32_0 : i32, i32
  }
  func.func @transform_6(%arg0: i32) -> (i32, i32) {
    %c0_i32 = arith.constant 0 : i32
    %c0_i32_0 = arith.constant 0 : i32
    %c0_i32_1 = arith.constant 0 : i32
    return %c0_i32, %c0_i32_0 : i32, i32
  }
  func.func @transform_7(%arg0: i32) -> (i32, i32) {
    %c0_i32 = arith.constant 0 : i32
    %c0_i32_0 = arith.constant 0 : i32
    return %arg0, %c0_i32 : i32, i32
  }
}

</mosaic_0001>

<bundles_post_ra>
// kernel: fused_forward.1
= control target key start
LH: loop header
LB: loop body
LE: loop exit
PB: predicated region body
PF: predicated region fallthrough
CT: control target
= control target key end

     0   :  { %12 = vsyncpa [#allocation3], 0  ;;  %s686_s0 = inlined_call_operand.vmem [shape: f32[16,64], index: 0, kind: input, shape index: {}]   ;;  %s687_s1 = inlined_call_operand.hbm [shape: bf16[64,128], index: 1, kind: input, shape index: {}]   ;;  %s688_s2 = inlined_call_operand.vmem [shape: f32[1,128], index: 2, kind: input, shape index: {}]   ;;  %s689_s3 = inlined_call_operand.hbm [shape: bf16[128,128], index: 3, kind: input, shape index: {}]   ;;  %s690_s4 = inlined_call_operand.vmem [shape: f32[1,128], index: 4, kind: input, shape index: {}]   ;;  %s691_s5 = inlined_call_operand.hbm [shape: bf16[128,128], index: 5, kind: input, shape index: {}]   ;;  %s692_s6 = inlined_call_operand.vmem [shape: f32[1,128], index: 6, kind: input, shape index: {}]   ;;  %s693_s7 = inlined_call_operand.vmem [shape: f32[16,128], index: 7, kind: output, shape index: {}]  }
   0x1   :  { %13 = vsyncpa [#allocation5], 0  ;;  %s583_s24 = smov [#allocation4]   ;;  %s584_s26 = smov [#allocation2]  }
   0x2   :  { %s35_s25 = sshll.u32 %s583_s24, 4  ;;  %s21_s27 = sshll.u32 %s584_s26, 4  ;;  %s36_s25 = int_to_ptr.vmem [resolvable:$true] %s35_s25  ;;  %s22_s27 = int_to_ptr.vmem [resolvable:$true] %s21_s27 }
   0x3   :  { %s527_s28 = scalar_lea.vmem %s36_s25, 1024  ;;  %p532_p1 = scmp.lt.s32.totalorder %s36_s25, %s36_s25 }
   0x4   :  { %p528_p0 = scmp.ne.s32.totalorder %s36_s25, %s527_s28  ;;  %p533_p2 = scmp.lt.s32.totalorder %s527_s28, %s527_s28 }
   0x6   :  { %p534_p3 = por %p533_p2, %p532_p1 }
   0x8   :  { %p535_p4 = pnand %p534_p3, %p528_p0 }
   0xa   :  { %538 = shalt.err (!%p535_p4)
}
   0xb   :  { %s585_s29 = smov 64   ;;  %s586_s30 = smov 4  }
   0xc   :  { %41 = dma.hbm_to_vmem [thread:$0]  %s689_s3, 1024, %s36_s25, [#allocation5], %s585_s29, %s585_s29, %s586_s30  }
   0xd   :  { %s547_s10 = scalar_lea.vmem %s22_s27, 512  ;;  %p552_p6 = scmp.lt.s32.totalorder %s22_s27, %s22_s27 }
   0xe   :  { %p548_p5 = scmp.ne.s32.totalorder %s22_s27, %s547_s10  ;;  %p553_p7 = scmp.lt.s32.totalorder %s547_s10, %s547_s10 }
  0x10   :  { %p554_p8 = por %p553_p7, %p552_p6 }
  0x12   :  { %p555_p9 = pnand %p554_p8, %p548_p5 }
  0x14   :  { %558 = shalt.err (!%p555_p9)
}
  0x15   :  { %27 = dma.hbm_to_vmem [thread:$0]  %s687_s1, 512, %s22_s27, [#allocation3], %s585_s29, %s585_s29, %s586_s30  }
  0x16   :  { %s587_s13 = smov [#allocation6]  }
  0x17   :  { %s49_s14 = sshll.u32 %s587_s13, 4  ;;  %s50_s14 = int_to_ptr.vmem [resolvable:$true] %s49_s14 }
  0x18   :  { %s567_s15 = scalar_lea.vmem %s50_s14, 1024  ;;  %p572_p11 = scmp.lt.s32.totalorder %s50_s14, %s50_s14 }
  0x19   :  { %p568_p10 = scmp.ne.s32.totalorder %s50_s14, %s567_s15  ;;  %p573_p12 = scmp.lt.s32.totalorder %s567_s15, %s567_s15 }
  0x1b   :  { %p574_p13 = por %p573_p12, %p572_p11 }
  0x1d   :  { %p575_p0 = pnand %p574_p13, %p568_p10 }
  0x1f   :  { %578 = shalt.err (!%p575_p0)
}
  0x20   :  { %55 = dma.hbm_to_vmem [thread:$0]  %s691_s5, 1024, %s50_s14, [#allocation5], %s585_s29, %s585_s29, %s586_s30  }
  0x21   :  { %579 = dma.done.wait [#allocation3], 512  }
  0x22   :  { %580 = vsyncadd [#allocation3], 4294966784 }
  0x23   :  { %581 = dma.done.wait [#allocation5], 2048  }
  0x24   :  { %582 = vsyncadd [#allocation5], 4294965248  ;;  %v588_v0 = vmov 0.0   ;;  %vm589_vm0 = vmmov 0   ;;  %v499_v1 = vld [vmem:[#allocation2 + $0x18] sm:$0xff]   ;;  %v500_v2 = vld [vmem:[#allocation2 + $0x10] sm:$0xff]  }
  0x25   :  { %440 = vmatprep.subr.bf16.mxu0 %v588_v0  ;;  %448 = vmatprep.mubr.msk.bf16.mxu0 %vm589_vm0, %v588_v0  ;;  %v503_v3 = vld [vmem:[#allocation4 + $0x38] sm:$0xff]   ;;  %v501_v4 = vld [vmem:[#allocation2 + $0x8] sm:$0xff]   ;;  %v504_v5 = vld [vmem:[#allocation4 + $0x30] sm:$0xff]   ;;  %vm110_vm1 = vcmask 523264  }
  0x26   :  { %452 = vmatprep.subr.bf16.mxu1 %v588_v0  ;;  %468 = vmatprep.mubr.msk.bf16.mxu1 %vm589_vm0, %v588_v0  ;;  %v502_v6 = vld [vmem:[#allocation2] sm:$0xff]   ;;  %v69_v8 = vld [vmem:[%s686_s0 + $0x8] sm:$0xff]  ;;  %v507_v12 = vld [vmem:[#allocation4 + $0x18] sm:$0xff]  }
  0x27   :  { %441 = vmatpush3.bf16.msra.mxu0 %v499_v1  ;;  %453 = vmatpush3.bf16.msra.mxu1 %v503_v3  ;;  %v68_v7 = vld [vmem:[%s686_s0] sm:$0xff]  ;;  %v505_v9 = vld [vmem:[#allocation4 + $0x28] sm:$0xff]   ;;  %v508_v13 = vld [vmem:[#allocation4 + $0x10] sm:$0xff]  }
  0x28   :  { %442 = vmatprep.subr.bf16.mxu0 %v588_v0  ;;  %454 = vmatprep.subr.bf16.mxu1 %v588_v0  ;;  %v70_v10 = vpack.c.bf16 %v69_v8, %v68_v7  ;;  %v506_v11 = vld [vmem:[#allocation4 + $0x20] sm:$0xff]   ;;  %v509_v14 = vld [vmem:[#allocation4 + $0x8] sm:$0xff]   ;;  %v511_v16 = vld [vmem:[#allocation6 + $0x38] sm:$0xff]  }
  0x29   :  { %v510_v15 = vld [vmem:[#allocation4] sm:$0xff]   ;;  %v512_v17 = vld [vmem:[#allocation6 + $0x30] sm:$0xff]   ;;  %v513_v18 = vld [vmem:[#allocation6 + $0x28] sm:$0xff]  }
  0x2a   :  { %v514_v19 = vld [vmem:[#allocation6 + $0x20] sm:$0xff]   ;;  %v515_v20 = vld [vmem:[#allocation6 + $0x18] sm:$0xff]   ;;  %v516_v31 = vld [vmem:[#allocation6 + $0x10] sm:$0xff]  }
  0x2b   :  { %443 = vmatpush3.bf16.msra.mxu0 %v500_v2  ;;  %455 = vmatpush3.bf16.msra.mxu1 %v504_v5  ;;  %v393_v21 = vld [vmem:[%s688_s2] ss:$0 sm:$0xff]  ;;  %v517_v32 = vld [vmem:[#allocation6 + $0x8] sm:$0xff]  }
  0x2c   :  { %444 = vmatprep.subr.bf16.mxu0 %v588_v0  ;;  %456 = vmatprep.subr.bf16.mxu1 %v588_v0  ;;  %v518_v33 = vld [vmem:[#allocation6] sm:$0xff]  }
  0x2d   :  { %v399_v34 = vld [vmem:[%s690_s4] ss:$0 sm:$0xff] }
  0x2e   :  { %v408_v44 = vld [vmem:[%s692_s6] ss:$0 sm:$0xff] }
  0x2f   :  { %445 = vmatpush3.bf16.msra.mxu0 %v501_v4  ;;  %457 = vmatpush3.bf16.msra.mxu1 %v505_v9 }
  0x30   :  { %446 = vmatprep.subr.bf16.mxu0 %v588_v0  ;;  %458 = vmatprep.subr.bf16.mxu1 %v588_v0 }
  0x33   :  { %447 = vmatpush3.bf16.msra.mxu0 %v502_v6  ;;  %459 = vmatpush3.bf16.msra.mxu1 %v506_v11 }
  0x34   :  { %472 = vmatprep.subr.bf16.mxu0 %v588_v0  ;;  %460 = vmatprep.subr.bf16.mxu1 %v588_v0 }
  0x36   :  { %449 = vmatmul.mubr.msk.bf16.vlgmr.msra.gmra.mxu0 %vm110_vm1, %v70_v10 }
  0x37   :  { %488 = vmatprep.mubr.msk.bf16.mxu0 %vm589_vm0, %v588_v0  ;;  %461 = vmatpush3.bf16.msra.mxu1 %v507_v12 }
  0x38   :  { %462 = vmatprep.subr.bf16.mxu1 %v588_v0  ;;  %473 = vmatpush3.bf16.msra.mxu0 %v511_v16 }
  0x39   :  { %474 = vmatprep.subr.bf16.mxu0 %v588_v0 }
  0x3b   :  { %463 = vmatpush3.bf16.msra.mxu1 %v508_v13 }
  0x3c   :  { %464 = vmatprep.subr.bf16.mxu1 %v588_v0  ;;  %475 = vmatpush3.bf16.msra.mxu0 %v512_v17 }
  0x3d   :  { %476 = vmatprep.subr.bf16.mxu0 %v588_v0 }
  0x3f   :  { %465 = vmatpush3.bf16.msra.mxu1 %v509_v14 }
  0x40   :  { %466 = vmatprep.subr.bf16.mxu1 %v588_v0  ;;  %477 = vmatpush3.bf16.msra.mxu0 %v513_v18 }
  0x41   :  { %478 = vmatprep.subr.bf16.mxu0 %v588_v0 }
  0x43   :  { %467 = vmatpush3.bf16.msra.mxu1 %v510_v15 }
  0x44   :  { %479 = vmatpush3.bf16.msra.mxu0 %v514_v19 }
  0x45   :  { %480 = vmatprep.subr.bf16.mxu0 %v588_v0 }
  0x48   :  { %481 = vmatpush3.bf16.msra.mxu0 %v515_v20 }
  0x49   :  { %482 = vmatprep.subr.bf16.mxu0 %v588_v0 }
  0x4c   :  { %483 = vmatpush3.bf16.msra.mxu0 %v516_v31 }
  0x4d   :  { %484 = vmatprep.subr.bf16.mxu0 %v588_v0 }
  0x50   :  { %485 = vmatpush3.bf16.msra.mxu0 %v517_v32 }
  0x51   :  { %486 = vmatprep.subr.bf16.mxu0 %v588_v0 }
  0x54   :  { %487 = vmatpush3.bf16.msra.mxu0 %v518_v33 }
  0xf6   :  { %v148_v22 = vpop.f32.mrf.mxu0 }
  0xf7   :  { %v149_v24 = vadd.f32 %v393_v21, %v148_v22 }
  0xf8   :  { %v450_v23 = vpop.f32.mrf.mxu0 }
  0xf9   :  { %v155_v28 = vmax.f32 %v149_v24, 0.0 }
  0xfa   :  { %v151_v25 = vpop.f32.mrf.mxu0 }
  0xfb   :  { %v152_v26 = vadd.f32 %v393_v21, %v151_v25 }
  0xfc   :  { %v451_v27 = vpop.f32.mrf.mxu0 }
  0xfd   :  { %v156_v29 = vmax.f32 %v152_v26, 0.0 }
  0xff   :  { %v157_v30 = vpack.c.bf16 %v156_v29, %v155_v28 }
 0x101   :  { %469 = vmatmul.mubr.bf16.vlgmr.msra.gmra.mxu1 %v157_v30 }
 0x1c1   :  { %v263_v35 = vpop.f32.mrf.mxu1 }
 0x1c2   :  { %v264_v37 = vadd.f32 %v399_v34, %v263_v35 }
 0x1c3   :  { %v470_v36 = vpop.f32.mrf.mxu1 }
 0x1c4   :  { %v270_v41 = vmax.f32 %v264_v37, 0.0 }
 0x1c5   :  { %v266_v38 = vpop.f32.mrf.mxu1 }
 0x1c6   :  { %v267_v39 = vadd.f32 %v399_v34, %v266_v38 }
 0x1c7   :  { %v471_v40 = vpop.f32.mrf.mxu1 }
 0x1c8   :  { %v271_v42 = vmax.f32 %v267_v39, 0.0 }
 0x1ca   :  { %v272_v43 = vpack.c.bf16 %v271_v42, %v270_v41 }
 0x1cc   :  { %489 = vmatmul.mubr.bf16.vlgmr.msra.gmra.mxu0 %v272_v43 }
 0x28c   :  { %v378_v45 = vpop.f32.mrf.mxu0 }
 0x28d   :  { %v379_v46 = vadd.f32 %v408_v44, %v378_v45 }
 0x28e   :  { %v490_v47 = vpop.f32.mrf.mxu0 }
 0x28f   :  { %385 = vst [vmem:[%s693_s7] sm:$0xff] %v379_v46 }
 0x290   :  { %v381_v48 = vpop.f32.mrf.mxu0 }
 0x291   :  { %v382_v49 = vadd.f32 %v408_v44, %v381_v48 }
 0x292   :  { %v491_v50 = vpop.f32.mrf.mxu0 }
 0x293   :  { %386 = vst [vmem:[%s693_s7 + $0x8] sm:$0xff] %v382_v49 }
 0x294   :  { %391 = vsyncpa [#allocation3], 1 }
 0x295   :  { %392 = vsyncpa [#allocation5], 1 }

</bundles_post_ra>
